<compile_context>
chip_gen: v5e
topology: v5e:2x2
jax: 0.10.0
libtpu: 0.0.40
codegen_flags: <defaults>
</compile_context>

<pallas_src>
import functools

import jax
import jax.numpy as jnp
from jax.experimental import pallas as pl
from jax.experimental.pallas import tpu as pltpu


def _round_up(x: int, m: int) -> int:
    return (x + m - 1) // m * m


def _choose_tv(V: int, tile_v: int = 512) -> int:
    # Lane-dense 128-multiple vocab tile, clamped to the (padded) vocab.
    return min(_round_up(tile_v, 128), _round_up(V, 128))


def _choose_tm(M: int, tile_m: int = 1024) -> int:
    # bf16 vregs pack [16,128]; prefer full 256-multiples for full MXU tiles.
    Mp16 = _round_up(M, 16)
    if Mp16 >= 256:
        return min(_round_up(tile_m, 256), _round_up(Mp16, 256))
    return Mp16


# ----------------------------------------------------------------------------
# Pallas kernel: one (tm, tv) logits tile = x_tile @ w_tile
# ----------------------------------------------------------------------------
def gpt_head_kernel(x_ref, w_ref, out_ref):
    # x_ref: (tm, E) bf16   w_ref: (E, tv) bf16   out_ref: (tm, tv) f32/bf16
    out_ref[...] = jnp.dot(
        x_ref[...], w_ref[...], preferred_element_type=jnp.float32
    ).astype(out_ref.dtype)


def gpt_head_pallas(x, w_t, *, tile_m=1024, tile_v=512, out_dtype=jnp.float32):
    """x: (M, E) bf16 activations; w_t: (E, Vp) bf16, Vp already tile-padded.

    Returns (M, Vp) logits in `out_dtype`.
    """
    M, E = x.shape
    E2, Vp = w_t.shape
    assert E == E2

    tm = _choose_tm(M, tile_m)
    tv = _choose_tv(Vp, tile_v)
    assert Vp % tv == 0, "weight must be pre-padded to a tile-multiple vocab"

    Mp = _round_up(M, tm)
    if Mp != M:
        x = jnp.pad(x, ((0, Mp - M), (0, 0)))

    # m outer, v inner: the (tm, E) activation tile is the resident operand
    # (same block index across all v steps -> no re-DMA); weight tiles stream.
    grid = (Mp // tm, Vp // tv)

    out_bytes = jnp.dtype(out_dtype).itemsize
    # Double-buffered footprint: 2*(x tile + w tile) + 2*out tile, + headroom.
    needed = 2 * (tm * E * 2 + E * tv * 2) + 2 * tm * tv * out_bytes
    vmem_limit = min(max(needed + (2 << 20), 32 << 20), 64 << 20)

    cost = pl.CostEstimate(
        flops=2 * Mp * E * Vp,
        transcendentals=0,
        bytes_accessed=Mp * E * 2 + E * Vp * 2 + Mp * Vp * out_bytes,
    )

    out = pl.pallas_call(
        gpt_head_kernel,
        out_shape=jax.ShapeDtypeStruct((Mp, Vp), out_dtype),
        grid_spec=pltpu.PrefetchScalarGridSpec(
            num_scalar_prefetch=0,
            grid=grid,
            in_specs=[
                pl.BlockSpec((tm, E), lambda m, v: (m, 0)),   # activations (resident)
                pl.BlockSpec((E, tv), lambda m, v: (0, v)),   # W_out.T tile (streamed)
            ],
            out_specs=pl.BlockSpec((tm, tv), lambda m, v: (m, v)),
        ),
        compiler_params=pltpu.CompilerParams(
            dimension_semantics=("parallel", "parallel"),
            vmem_limit_bytes=vmem_limit,
        ),
        cost_estimate=cost,
    )(x, w_t)

    if Mp != M:
        out = out[:M, :]
    return out


# ----------------------------------------------------------------------------
# Params: raw f32 (reference) + prepared bf16/padded head weight (inference)
# ----------------------------------------------------------------------------
def init_params(config, key, *, tile_v=512):
    k_tok, k_pos, k_out = jax.random.split(key, 3)
    V = config["vocab_size"]
    E = config["embedding_dim"]
    C = config["context_length"]

    token_emb = jax.random.normal(k_tok, (V, E), jnp.float32) * 0.02
    pos_emb = jax.random.normal(k_pos, (C, E), jnp.float32) * 0.02
    # nn.Linear(E, V, bias=False) weight is (V, E); store transposed (E, V).
    out_head_w_t = jax.random.normal(k_out, (E, V), jnp.float32) * 0.02

    # Pre-cast + pre-pad ONCE, outside jit (perf review item #2).
    tv = _choose_tv(V, tile_v)
    Vp = _round_up(V, tv)
    w_bf16 = out_head_w_t.astype(jnp.bfloat16)
    if Vp != V:
        w_bf16 = jnp.pad(w_bf16, ((0, 0), (0, Vp - V)))

    return {
        "token_emb": token_emb,
        "pos_emb": pos_emb,
        "out_head_w_t": out_head_w_t,            # f32 reference copy
        "out_head_w_t_bf16": w_bf16,             # (E, Vp) bf16, tile-padded
    }


# ----------------------------------------------------------------------------
# Forward
# ----------------------------------------------------------------------------
@functools.partial(jax.jit, static_argnames=("logits_bf16",))
def dummy_gpt_forward(params, in_idx, *, logits_bf16=False):
    """in_idx: (B, S) int32 -> logits (B, S, vocab_size)."""
    B, S = in_idx.shape
    V, E = params["token_emb"].shape

    # Embedding gather + positional add (plain-JAX glue; XLA fuses into one
    # pass producing a single pre-summed activation slab).  Add is in f32.
    tok = jnp.take(params["token_emb"], in_idx.reshape(-1), axis=0)   # (B*S, E)
    pos = params["pos_emb"][:S]                                       # (S, E)
    x = (tok.reshape(B, S, E) + pos[None, :, :]).reshape(B * S, E)

    # Dropout / DummyTransformerBlock / DummyLayerNorm are identity in the
    # reference module (eval-mode dropout; dummy blocks return x unchanged).

    x_bf16 = x.astype(jnp.bfloat16)

    # TODO(synk): fold the token-embedding gather + pos add into the kernel
    # (scalar-prefetch ids + pl.Element row gather) to avoid the HBM round
    # trip of the (B*S, E) activation slab at real GPT sizes.
    out_dtype = jnp.bfloat16 if logits_bf16 else jnp.float32
    logits = gpt_head_pallas(
        x_bf16, params["out_head_w_t_bf16"], out_dtype=out_dtype
    )                                                                 # (B*S, Vp)
    logits = logits[:, :V]
    return logits.reshape(B, S, V)


# ----------------------------------------------------------------------------
# Main
# ----------------------------------------------------------------------------
if __name__ == "__main__":
    config = {
        "vocab_size": 256,
        "embedding_dim": 32,
        "context_length": 16,
        "drop_rate": 0.1,
        "num_layers": 2,
    }
    B, S = 2, 8

    key = jax.random.PRNGKey(0)
    k_params, k_idx = jax.random.split(key)
    params = init_params(config, k_params)
    in_idx = jax.random.randint(k_idx, (B, S), 0, config["vocab_size"], jnp.int32)

    logits = dummy_gpt_forward(params, in_idx)
    logits = jax.block_until_ready(logits)

    # Reference checks (plain JAX, no Pallas).
    tok = jnp.take(params["token_emb"], in_idx.reshape(-1), axis=0)
    pos = params["pos_emb"][:S]
    x = (tok.reshape(B, S, -1) + pos[None, :, :]).reshape(B * S, -1)
    # Same bf16-operand / f32-accumulate math as the kernel.
    ref_bf16 = jnp.dot(
        x.astype(jnp.bfloat16),
        params["out_head_w_t"].astype(jnp.bfloat16),
        preferred_element_type=jnp.float32,
    ).reshape(B, S, -1)
    # Full-f32 reference (loose tolerance: operands were rounded to bf16).
    ref_f32 = (x @ params["out_head_w_t"]).reshape(B, S, -1)

    assert logits.shape == (B, S, config["vocab_size"])
    assert jnp.allclose(logits, ref_bf16, atol=1e-4, rtol=1e-4)
    assert jnp.allclose(logits, ref_f32, atol=5e-3, rtol=5e-2)

    print("KERNEL_OK")
</pallas_src>

<mosaic_0001>
module attributes {stable_mosaic.version = 11 : i64} {
  func.func @gpt_head_kernel(%arg0: i32, %arg1: i32, %arg2: memref<16x32xbf16, #tpu.memory_space<vmem>>, %arg3: memref<32x256xbf16, #tpu.memory_space<vmem>>, %arg4: memref<16x256xf32, #tpu.memory_space<vmem>>) attributes {dimension_semantics = [#tpu.dimension_semantics<parallel>, #tpu.dimension_semantics<parallel>], iteration_bounds = array<i64: 1, 1>, scalar_prefetch = 0 : i64, scratch_operands = 0 : i64, tpu.core_type = #tpu.core_type<tc>, window_params = [{transform_indices = @transform_0, window_bounds = array<i64: 16, 32>}, {transform_indices = @transform_1, window_bounds = array<i64: 32, 256>}, {transform_indices = @transform_2, window_bounds = array<i64: 16, 256>}]} {
    %c0 = arith.constant 0 : index
    %c0_0 = arith.constant 0 : index
    %0 = vector.load %arg2[%c0, %c0_0] : memref<16x32xbf16, #tpu.memory_space<vmem>>, vector<16x32xbf16>
    %c0_1 = arith.constant 0 : index
    %c0_2 = arith.constant 0 : index
    %1 = vector.load %arg3[%c0_1, %c0_2] : memref<32x256xbf16, #tpu.memory_space<vmem>>, vector<32x256xbf16>
    %cst = arith.constant dense<0.000000e+00> : vector<16x256xf32>
    %2 = tpu.matmul %0, %1, %cst {dimension_numbers = #tpu.dot_dimension_numbers<[1], [0], [0], [1], [0, 0, 1, 1], [], []>} : vector<16x32xbf16>, vector<32x256xbf16>, vector<16x256xf32> -> vector<16x256xf32>
    %c0_3 = arith.constant 0 : index
    %c0_4 = arith.constant 0 : index
    %3 = vector.load %arg4[%c0_3, %c0_4] : memref<16x256xf32, #tpu.memory_space<vmem>>, vector<16x256xf32>
    tpu.vector_store %arg4[%c0_3, %c0_4], %2 {strides = array<i32>} : memref<16x256xf32, #tpu.memory_space<vmem>>, vector<16x256xf32>,
    return
  }
  func.func @transform_0(%arg0: i32, %arg1: i32) -> (i32, i32) {
    %c0_i32 = arith.constant 0 : i32
    %c0_i32_0 = arith.constant 0 : i32
    return %arg0, %c0_i32 : i32, i32
  }
  func.func @transform_1(%arg0: i32, %arg1: i32) -> (i32, i32) {
    %c0_i32 = arith.constant 0 : i32
    %c0_i32_0 = arith.constant 0 : i32
    return %c0_i32, %arg1 : i32, i32
  }
  func.func @transform_2(%arg0: i32, %arg1: i32) -> (i32, i32) {
    %c0_i32 = arith.constant 0 : i32
    return %arg0, %arg1 : i32, i32
  }
}

</mosaic_0001>

<bundles_post_ra>
// kernel: dummy_gpt_forward.1
= control target key start
LH: loop header
LB: loop body
LE: loop exit
PB: predicated region body
PF: predicated region fallthrough
CT: control target
= control target key end

     0   :  { %s202_s0 = inlined_call_operand.vmem [shape: bf16[16,32], index: 0, kind: input, shape index: {}]   ;;  %s203_s1 = inlined_call_operand.vmem [shape: bf16[32,256], index: 1, kind: input, shape index: {}]   ;;  %s204_s2 = inlined_call_operand.hbm [shape: f32[16,256], index: 2, kind: output, shape index: {}]  }
   0x1   :  { %v112_v0 = vld [vmem:[%s203_s1 + $0x10] sm:$0xf]  ;;  %v124_v1 = vld [vmem:[%s203_s1 + $0x14] sm:$0xf0]  ;;  %v123_v2 = vld [vmem:[%s203_s1 + $0x14] sm:$0xf] }
   0x2   :  { %v113_v3 = vor.u32 %v124_v1, %v112_v0  ;;  %v114_v4 = vld [vmem:[%s203_s1 + $0x18] sm:$0xf0]  ;;  %v104_v5 = vld [vmem:[%s203_s1] sm:$0xf]  ;;  %v122_v6 = vld [vmem:[%s203_s1 + $0x4] sm:$0xf0] }
   0x3   :  { %v117_v7 = vor.u32 %v123_v2, %v114_v4  ;;  %v121_v8 = vld [vmem:[%s203_s1 + $0x4] sm:$0xf]  ;;  %v106_v9 = vld [vmem:[%s203_s1 + $0x8] sm:$0xf0]  ;;  %v105_v10 = vor.u32 %v122_v6, %v104_v5 }
   0x4   :  { %54 = vmatpush.bf16.msra.mxu0 %v113_v3 }
   0x5   :  { %7 = vsyncpa [#allocation3], 0  ;;  %68 = vmatpush.bf16.msra.mxu1 %v117_v7  ;;  %v109_v11 = vor.u32 %v121_v8, %v106_v9  ;;  %v120_v12 = vld [vmem:[%s202_s0] sm:$0xff]  ;;  %vm44_vm0 = vcmask 261120   ;;  %s154_s27 = smov [#allocation2]   ;;  %s86_s30 = sshll.u32 %s204_s2, 4  ;;  %s87_s30 = int_to_ptr.hbm [resolvable:$true] %s86_s30 }
   0x6   :  { %s84_s1 = sshll.u32 %s154_s27, 4  ;;  %s155_s0 = smov 256   ;;  %s85_s1 = int_to_ptr.vmem [resolvable:$true] %s84_s1 }
   0x7   :  { %s156_s3 = smov 16  }
   0x8   :  { %55 = vmatpush.bf16.msra.mxu0 %v105_v10 }
   0x9   :  { %69 = vmatpush.bf16.msra.mxu1 %v109_v11 }
   0xb   :  { %118 = vmatmul.msk.bf16.vlgmr.msra.gmra.mxu0 %vm44_vm0, %v120_v12 }
   0xc   :  { %119 = vmatmul.msk.bf16.vlgmr.msra.gmra.mxu1 %vm44_vm0, %v120_v12 }
  0x88   :  { %v57_v13 = vpop.f32.mrf.mxu0 }
  0x89   :  { %76 = vst [vmem:[#allocation2] sm:$0xff] %v57_v13  ;;  %v71_v14 = vpop.f32.mrf.mxu1 }
  0x8a   :  { %77 = vst [vmem:[#allocation2 + $0x8] sm:$0xff] %v71_v14 }
  0x90   :  { %v59_v15 = vpop.f32.mrf.mxu0 }
  0x91   :  { %78 = vst [vmem:[#allocation2 + $0x10] sm:$0xff] %v59_v15  ;;  %v73_v16 = vpop.f32.mrf.mxu1 }
  0x92   :  { %79 = vst [vmem:[#allocation2 + $0x18] sm:$0xff] %v73_v16 }
  0x93   :  { %92 = dma.vmem_to_hbm [thread:$0]  %s85_s1, 512, %s87_s30, [#allocation3], %s155_s0, %s155_s0, %s156_s3  }
  0x94   :  { %152 = dma.done.wait [#allocation3], 512  }
  0x95   :  { %153 = vsyncadd [#allocation3], 4294966784 }
  0x96   :  { %97 = vsyncpa [#allocation3], 1 }

</bundles_post_ra>
